<compile_context>
chip_gen: v7x
topology: tpu7x:2x2x1
jax: 0.10.0
libtpu: 0.0.40
codegen_flags: <defaults>
</compile_context>

<pallas_src>
import math

import jax
import jax.numpy as jnp
from jax import lax
from jax.experimental import pallas as pl
from jax.experimental.pallas import tpu as pltpu


def _make_rms_norm_kernel(eps: float):
    def _rms_norm_kernel(x_ref, w_ref, o_ref):
        # x_ref: (tm, D)   w_ref: (1, D)   o_ref: (tm, D)
        # Pass 1: mean of squares, accumulated in f32.
        xf = x_ref[...].astype(jnp.float32)
        ms = jnp.mean(xf * xf, axis=-1, keepdims=True)        # (tm, 1)
        inv = lax.rsqrt(ms + eps)                              # EUP slot
        # Pass 2: scale.  Re-read the block so a full f32 upcast need not stay
        # live across the reduction for sub-32-bit inputs.
        w = w_ref[...].astype(jnp.float32)
        o_ref[...] = ((x_ref[...].astype(jnp.float32) * inv) * w).astype(o_ref.dtype)

    return _rms_norm_kernel


def _round_up(v: int, m: int) -> int:
    return ((v + m - 1) // m) * m


def rms_norm(x, weight, eps: float = 1e-6,
             target_block_bytes: int = 2 << 20,
             min_grid_steps: int = 8):
    """RMSNorm over the last dim. x: (..., D), weight: (D,) -> (..., D)."""
    orig_shape = x.shape
    d = orig_shape[-1]
    n = int(math.prod(orig_shape[:-1])) if len(orig_shape) > 1 else 1

    x2 = x.reshape(n, d)
    w2 = weight.reshape(1, d)

    itemsize = jnp.dtype(x.dtype).itemsize
    # Packed-sublane multiple: 8 (f32), 16 (bf16/f16), 32 (int8/fp8).
    sub = max(8, 32 // itemsize)

    # Row tile from a byte budget: MiB-class x-blocks amortize the ~0.35us
    # fixed per-step cost on this purely HBM-bandwidth-bound kernel.
    row_bytes = max(d * itemsize, 1)
    tm = max(sub, (target_block_bytes // row_bytes) // sub * sub)
    # Keep enough grid steps so both v7x TensorCores get work and the
    # prefetch/writeback pipeline has something to overlap.
    tm = min(tm, max(sub, _round_up(pl.cdiv(n, min_grid_steps), sub)))
    # Never larger than the (sublane-rounded) row count.
    tm = min(tm, _round_up(n, sub))

    grid = (pl.cdiv(n, tm),)   # partial last block: OOB rows computed, stores masked

    # VMEM budget: 2x input blocks + 2x output blocks + ~2 f32 temporaries
    # + resident weight + slack.  Clamp to stay within v7x's 64 MiB physical.
    block_bytes = tm * d * itemsize
    needed = 4 * block_bytes + 2 * tm * d * 4 + d * 4 + (2 << 20)
    vmem_limit = int(min(max(needed, 32 << 20), 48 << 20))

    out = pl.pallas_call(
        _make_rms_norm_kernel(eps),
        out_shape=jax.ShapeDtypeStruct((n, d), x.dtype),
        grid=grid,
        in_specs=[
            pl.BlockSpec((tm, d), lambda i: (i, 0)),   # x rows, auto double-buffered
            pl.BlockSpec((1, d), lambda i: (0, 0)),    # weight, VMEM-resident
        ],
        out_specs=pl.BlockSpec((tm, d), lambda i: (i, 0)),
        compiler_params=pltpu.CompilerParams(
            dimension_semantics=("parallel",),
            vmem_limit_bytes=vmem_limit,
        ),
    )(x2, w2)

    return out.reshape(orig_shape)


def _reference(x, weight, eps: float = 1e-6):
    xf = x.astype(jnp.float32)
    ms = jnp.mean(xf * xf, axis=-1, keepdims=True)
    return (xf * lax.rsqrt(ms + eps) * weight.astype(jnp.float32)).astype(x.dtype)


if __name__ == "__main__":
    BATCH, SEQ, DIM = 2, 8, 256   # DIM multiple of 128 -> lane-dense output

    key = jax.random.PRNGKey(0)
    k_x, k_w = jax.random.split(key)

    x = jax.random.normal(k_x, (BATCH, SEQ, DIM), dtype=jnp.float32)
    # Module init is ones; perturb slightly so the weight multiply is exercised.
    weight = jnp.ones((DIM,), dtype=jnp.float32) + 0.1 * jax.random.normal(
        k_w, (DIM,), dtype=jnp.float32
    )

    # f32 path (multi-block grid: tm is capped for min_grid_steps).
    out = rms_norm(x, weight, eps=1e-6)
    out = jax.block_until_ready(out)
    ref = _reference(x, weight, eps=1e-6)
    assert out.shape == x.shape
    assert jnp.allclose(out, ref, atol=1e-5, rtol=1e-5)

    # bf16 path (exercises the 16-row packed-sublane tile choice).
    x_bf = x.astype(jnp.bfloat16)
    w_bf = weight.astype(jnp.bfloat16)
    out_bf = jax.block_until_ready(rms_norm(x_bf, w_bf, eps=1e-6))
    ref_bf = _reference(x_bf, w_bf, eps=1e-6)
    assert out_bf.shape == x_bf.shape
    assert jnp.allclose(out_bf.astype(jnp.float32), ref_bf.astype(jnp.float32),
                        atol=3e-2, rtol=3e-2)

    print("KERNEL_OK")
</pallas_src>

<mosaic_0001>
module attributes {stable_mosaic.version = 11 : i64} {
  func.func @_rms_norm_kernel(%arg0: i32, %arg1: memref<8x256xf32, #tpu.memory_space<vmem>>, %arg2: memref<1x256xf32, #tpu.memory_space<vmem>>, %arg3: memref<8x256xf32, #tpu.memory_space<vmem>>) attributes {dimension_semantics = [#tpu.dimension_semantics<parallel>], iteration_bounds = array<i64: 2>, scalar_prefetch = 0 : i64, scratch_operands = 0 : i64, tpu.core_type = #tpu.core_type<tc>, window_params = [{transform_indices = @transform_0, window_bounds = array<i64: 8, 256>}, {pipeline_mode = #tpu.pipeline_mode<synchronous>, transform_indices = @transform_1, window_bounds = array<i64: 1, 256>}, {transform_indices = @transform_2, window_bounds = array<i64: 8, 256>}]} {
    %c0 = arith.constant 0 : index
    %c0_0 = arith.constant 0 : index
    %0 = vector.load %arg1[%c0, %c0_0] : memref<8x256xf32, #tpu.memory_space<vmem>>, vector<8x256xf32>
    %1 = arith.mulf %0, %0 : vector<8x256xf32>
    %cst = arith.constant dense<0.000000e+00> : vector<8xf32>
    %2 = vector.multi_reduction <add>, %1, %cst [1] : vector<8x256xf32> to vector<8xf32>
    %3 = vector.shape_cast %2 : vector<8xf32> to vector<8x1xf32>
    %cst_1 = arith.constant 2.560000e+02 : f32
    %4 = vector.broadcast %cst_1 : f32 to vector<8x1xf32>
    %5 = arith.divf %3, %4 : vector<8x1xf32>
    %cst_2 = arith.constant 9.99999997E-7 : f32
    %6 = vector.broadcast %cst_2 : f32 to vector<8x1xf32>
    %7 = arith.addf %5, %6 : vector<8x1xf32>
    %8 = math.rsqrt %7 : vector<8x1xf32>
    %c0_3 = arith.constant 0 : index
    %c0_4 = arith.constant 0 : index
    %9 = vector.load %arg2[%c0_3, %c0_4] : memref<1x256xf32, #tpu.memory_space<vmem>>, vector<1x256xf32>
    %c0_5 = arith.constant 0 : index
    %c0_6 = arith.constant 0 : index
    %10 = vector.load %arg1[%c0_5, %c0_6] : memref<8x256xf32, #tpu.memory_space<vmem>>, vector<8x256xf32>
    %11 = vector.broadcast %8 : vector<8x1xf32> to vector<8x256xf32>
    %12 = arith.mulf %10, %11 : vector<8x256xf32>
    %13 = vector.broadcast %9 : vector<1x256xf32> to vector<8x256xf32>
    %14 = arith.mulf %12, %13 : vector<8x256xf32>
    %c0_7 = arith.constant 0 : index
    %c0_8 = arith.constant 0 : index
    %15 = vector.load %arg3[%c0_7, %c0_8] : memref<8x256xf32, #tpu.memory_space<vmem>>, vector<8x256xf32>
    tpu.vector_store %arg3[%c0_7, %c0_8], %14 {strides = array<i32>} : memref<8x256xf32, #tpu.memory_space<vmem>>, vector<8x256xf32>,
    return
  }
  func.func @transform_0(%arg0: i32) -> (i32, i32) {
    %c0_i32 = arith.constant 0 : i32
    %c0_i32_0 = arith.constant 0 : i32
    return %arg0, %c0_i32 : i32, i32
  }
  func.func @transform_1(%arg0: i32) -> (i32, i32) {
    %c0_i32 = arith.constant 0 : i32
    %c0_i32_0 = arith.constant 0 : i32
    %c0_i32_1 = arith.constant 0 : i32
    return %c0_i32, %c0_i32_0 : i32, i32
  }
  func.func @transform_2(%arg0: i32) -> (i32, i32) {
    %c0_i32 = arith.constant 0 : i32
    %c0_i32_0 = arith.constant 0 : i32
    return %arg0, %c0_i32 : i32, i32
  }
}

</mosaic_0001>

<bundles_post_ra>
// kernel: tpu_custom_call.1
= control target key start
LH: loop header
LB: loop body
LE: loop exit
PB: predicated region body
PF: predicated region fallthrough
CT: control target
= control target key end

     0   :  { %7 = vsyncpa [#allocation3], 0  ;;  %s617_s0 = inlined_call_operand.hbm [shape: f32[16,256], index: 0, kind: input, shape index: {}]   ;;  %s618_s1 = inlined_call_operand.vmem [shape: f32[1,256], index: 1, kind: input, shape index: {}]   ;;  %s619_s2 = inlined_call_operand.hbm [shape: f32[16,256], index: 2, kind: output, shape index: {}]  }
   0x1   :  { %9 = vsyncpa [#allocation3 + $0x1], 0 }
   0x2   :  { %10 = vsyncpa [#allocation4], 0 }
   0x3   :  { %12 = vsyncpa [#allocation4 + $0x1], 0  ;;  %s453_s9 = smov 0   ;;  %s455_s10 = smov 0  }
   0x4   :  { %s457_s11 = smov 0   ;;  %s459_s12 = smov 0  }
   0x5 LB: > { %s474_s13 = sadd.s32 4294967295, %s434_s12   ;;  %s274_s14 = sadd.s32 4294967294, %s434_s12   ;;  %s434_s12 = sphi %s459_s12, %s634_s12   ;;  %s430_s11 = sphi %s457_s11, %s633_s11   ;;  %s426_s10 = sphi %s455_s10, %s632_s10   ;;  %s422_s9 = sphi %s453_s9, %s631_s9  }
   0x6   : > { %s478_s15 = sadd.s32 1, %s434_s12   ;;  %s25_s16 = sadd.s32 1, %s430_s11 }
   0x7   : > { %s22_s17 = ssub.s32 %s434_s12, %s478_s15  ;;  %p32_p0 = scmp.ne.s32.totalorder %s430_s11, %s426_s10 }
   0x8   : > { %p23_p1 = scmp.eq.s32.totalorder %s22_s17, 0  ;;  %p33_p2 = scmp.eq.s32.totalorder %s434_s12, 0 }
   0x9   : > { %p38_p3 = scmp.ne.s32.totalorder %s426_s10, %s422_s9  ;;  %p39_p4 = scmp.eq.s32.totalorder %s474_s13, 0 }
   0xa   : > { %s490_s18 = scalar_select %p23_p1, %s430_s11, %s25_s16  }
   0xb   : > { %p492_p5 = por %p33_p2, %p32_p0  ;;  %p496_p6 = por %p39_p4, %p38_p3 }
   0xc   : > { %p83_p7 = scmp.eq.s32.totalorder %s474_s13, 1  ;;  %p89_p8 = scmp.eq.s32.totalorder %s274_s14, 1 }
   0xd   : > { %p302_p10 = scmp.lt.s32.totalorder %s434_s12, 2  ;;  %s112_s23 = sand.u32 1, %s430_s11  }
   0xe   : > { %p503_p11 = por %p83_p7, %p32_p0  ;;  %p507_p12 = por %p89_p8, %p38_p3 }
   0xf   : > { %s288_s24 = sshll.u32 %s434_s12, 8  ;;  %s277_s25 = sshll.u32 %s112_s23, 4 }
  0x10   : > { %s623_s21 = scalar_select %p503_p11, 1, 0 }
  0x11   : > { %s624_s22 = scalar_select %p507_p12, 1, 0 }
  0x12   : > { %s516_s28 = scalar_lea.hbm %s617_s0, %s288_s24  ;;  %s116_s29 = scalar_lea.vmem [#allocation2], %s277_s25 }
  0x13   : > { %s124_s30 = sshll.u32 %s116_s29, 4  ;;  %p520_p13 = pnand %p302_p10, %p492_p5  ;;  %s524_s30 = int_to_ptr.vmem [resolvable:$true] %s124_s30 }
  0x14   : > { %s113_s4 = scalar_lea.sflag [#allocation3], %s112_s23  ;;  %s338_s5 = scalar_lea.hbm %s516_s28, 256 }
  0x15   : > { %p339_p2 = scmp.ne.s32.totalorder %s516_s28, %s338_s5  ;;  %p340_p3 = pneg %p520_p13 }
  0x16   : > { %s343_s8 = scalar_lea.hbm %s617_s0, 512  ;;  %p344_p5 = scmp.lt.u32.totalorder %s516_s28, %s617_s0 }
  0x17   : > { %p341_p4 = pnand %p340_p3, %p339_p2  ;;  %p345_p8 = scmp.lt.u32.totalorder %s343_s8, %s338_s5 }
  0x18   : > { %p347_p9 = scmp.lt.u32.totalorder %s338_s5, %s516_s28 }
  0x19   : > { %p342_p7 = pneg %p341_p4  ;;  %p346_p10 = por %p345_p8, %p344_p5 }
  0x1b   : > { %p348_p0 = por %p347_p9, %p346_p10 }
  0x1d   : > { %p349_p1 = pnand %p348_p0, %p342_p7 }
  0x1f   : > { %352 = shalt.err (!%p349_p1)
}
  0x20   : > { %s353_s17 = scalar_lea.vmem %s524_s30, 256  ;;  %s436_s19 = smov [#allocation2]  }
  0x21   : > { %p354_p2 = scmp.ne.s32.totalorder %s524_s30, %s353_s17  ;;  %s358_s23 = sshll.u32 %s436_s19, 4  ;;  %s359_s23 = int_to_ptr.vmem [resolvable:$false] %s358_s23 }
  0x22   : > { %s360_s24 = scalar_lea.vmem %s359_s23, 512  ;;  %p361_p11 = scmp.lt.s32.totalorder %s524_s30, %s359_s23 }
  0x23   : > { %p356_p4 = pnand %p354_p2, %p340_p3  ;;  %p362_p5 = scmp.lt.s32.totalorder %s360_s24, %s353_s17 }
  0x25   : > { %p357_p12 = pneg %p356_p4  ;;  %p363_p8 = por %p362_p5, %p361_p11 }
  0x27   : > { %p364_p9 = pnand %p363_p8, %p357_p12 }
  0x29   : > { %367 = shalt.err (!%p364_p9)
}
  0x2a   : > { %297 = dma.hbm_to_vmem [thread:$0]  (!%p520_p13), %s516_s28, 256, %s524_s30, %s113_s4  }
  0x2b   : > { %p626_p0 = scmp.lt.s32.totalorder %s434_s12, 3  ;;  %p627_p1 = scmp.ge.s32.totalorder %s434_s12, 1 }
  0x2d   : > { %p130_p3 = pnand %p627_p1, %p626_p0 }
  0x2e   : > { %s558_s25 = sand.u32 (!%p130_p3), 1, %s426_s10  }
  0x2f   : > { %133 = sbr.rel (%p130_p3) target bundleno = 235 (0xeb), region = 28  ;;  %s281_s26 = sshll.u32 (!%p130_p3), %s558_s25, 4 }
  0x30   : > { %s136_s27 = scalar_lea.sflag (!%p130_p3), [#allocation3], %s558_s25  ;;  %s139_s29 = scalar_lea.vmem (!%p130_p3), [#allocation2], %s281_s26 }
  0x36   : > { %413 = dma.done.wait (%p496_p6), %s136_s27, 256  }
  0x37   : > { %415 = vsyncadd (%p496_p6), %s136_s27, 4294967040  ;;  %v160_v0 = vld [vmem:[%s139_s29] sm:$0xff]  ;;  %v161_v1 = vld [vmem:[%s139_s29 + $0x8] sm:$0xff]  ;;  %v175_v7 = vlaneseq  ;;  %s289_s20 = sshll.u32 %s474_s13, 8  ;;  %s159_s3 = scalar_lea.vmem [#allocation5], %s281_s26 }
  0x38   : > { %v162_v2 = vmul.f32 %v160_v0, %v160_v0  ;;  %v163_v3 = vmul.f32 %v161_v1, %v161_v1  ;;  %v171_v12 = vld [vmem:[%s618_s1] sm:$0x3]  ;;  %s204_s4 = sshll.u32 %s159_s3, 4  ;;  %s573_s7 = scalar_lea.hbm %s619_s2, %s289_s20  ;;  %s575_s4 = int_to_ptr.vmem [resolvable:$true] %s204_s4 }
  0x39   : > { %v176_v9 = vshrl.u32 %v175_v7, 7  ;;  %s190_s8 = scalar_lea.sflag [#allocation4], %s558_s25  ;;  %s368_s13 = scalar_lea.vmem %s575_s4, 256 }
  0x3a   : > { %v164_v4 = vadd.f32 %v163_v3, %v162_v2  ;;  %p369_p6 = scmp.ne.s32.totalorder %s575_s4, %s368_s13  ;;  %p628_p11 = scmp.ne.s32.totalorder %s623_s21, 0 }
  0x3b   : > { %v177_v10 = vsub.s32 0, %v176_v9  ;;  %v181_v11 = vsub.s32 1, %v176_v9  ;;  %s437_s14 = smov [#allocation5]  }
  0x3c   : > { %165 = vadd.xlane.f32.xlu0 %v164_v4  ;;  %p370_p12 = pnand %p369_p6, %p628_p11  ;;  %s372_s16 = sshll.u32 %s437_s14, 4  ;;  %s373_s16 = int_to_ptr.vmem [resolvable:$false] %s372_s16 }
  0x3d   : > { %v178_v13 = vrot.slane %v171_v12, %v177_v10  ;;  %v182_v14 = vrot.slane %v171_v12, %v181_v11  ;;  %s374_s17 = scalar_lea.vmem %s373_s16, 512  ;;  %p375_p7 = scmp.lt.s32.totalorder %s575_s4, %s373_s16 }
  0x3e   : > { %p371_p13 = pneg %p370_p12  ;;  %p376_p10 = scmp.lt.s32.totalorder %s374_s17, %s368_s13 }
  0x40   : > { %p377_p2 = por %p376_p10, %p375_p7 }
  0x42   : > { %p378_p4 = pnand %p377_p2, %p371_p13 }
  0xc9   : > { %v166_v5 = vpop.xlane.xlu0 %165 }
  0xca   : > { %v168_v6 = vmul.f32 0.00390625, %v166_v5 }
  0xcc   : > { %v169_v8 = vadd.f32 1e-06, %v168_v6 }
  0xce   : > { %336 = vrsqrt.f32 %v169_v8 }
  0xd8   : > { %v337_v15 = vpop.eup %336 }
  0xd9   : > { %v172_v16 = vmul.f32 %v337_v15, %v160_v0  ;;  %v173_v17 = vmul.f32 %v337_v15, %v161_v1 }
  0xdb   : > { %v185_v18 = vmul.f32 %v178_v13, %v172_v16  ;;  %v186_v19 = vmul.f32 %v182_v14, %v173_v17 }
  0xdd   : > { %187 = vst [vmem:[%s159_s3] sm:$0xff] %v185_v18  ;;  %188 = vst [vmem:[%s159_s3 + $0x8] sm:$0xff] %v186_v19 }
  0xde   : > { %381 = shalt.err (!%p378_p4)
}
  0xdf   : > { %s382_s19 = scalar_lea.hbm %s573_s7, 256  ;;  %s386_s25 = scalar_lea.hbm %s619_s2, 512 }
  0xe0   : > { %p383_p5 = scmp.ne.s32.totalorder %s573_s7, %s382_s19  ;;  %p387_p0 = scmp.lt.u32.totalorder %s573_s7, %s619_s2 }
  0xe1   : > { %p388_p1 = scmp.lt.u32.totalorder %s386_s25, %s382_s19  ;;  %p390_p6 = scmp.lt.u32.totalorder %s382_s19, %s573_s7 }
  0xe2   : > { %p384_p8 = pnand %p383_p5, %p628_p11 }
  0xe3   : > { %p389_p3 = por %p388_p1, %p387_p0 }
  0xe4   : > { %p385_p9 = pneg %p384_p8 }
  0xe5   : > { %p391_p12 = por %p390_p6, %p389_p3 }
  0xe7   : > { %p392_p13 = pnand %p391_p12, %p385_p9 }
  0xe9   : > { %395 = shalt.err (!%p392_p13)
}
  0xea   : > { %292 = dma.vmem_to_hbm [thread:$0]  (%p628_p11), %s575_s4, 256, %s573_s7, %s190_s8  }
  0xeb PF: > { %s216_s29 = sand.u32 1, %s422_s9   ;;  %p629_p7 = scmp.ne.s32.totalorder %s624_s22, 0 }
  0xec   : > { %p630_p10 = scmp.ge.s32.totalorder %s434_s12, 2  ;;  %s217_s28 = scalar_lea.sflag [#allocation4], %s216_s29 }
  0xee   : > { %p299_p2 = pnand %p630_p10, %p629_p7 }
  0xf0   : > { %417 = dma.done.wait (!%p299_p2), %s217_s28, 256  }
  0xf1   : > { %419 = vsyncadd (!%p299_p2), %s217_s28, 4294967040  ;;  %p15_p4 = scmp.ge.s32.totalorder %s478_s15, 4   ;;  %s631_s9 = smov %s426_s10 }
  0xf2   : > { %s632_s10 = smov %s430_s11  ;;  %s633_s11 = smov %s490_s18 }
  0xf3   : > { %s634_s12 = smov %s478_s15  ;;  %17 = sbr.rel (!%p15_p4) target bundleno = 5 (0x5), region = 73 }
  0xfa   :  { %222 = vsyncpa [#allocation3], 1 }
  0xfb   :  { %224 = vsyncpa [#allocation3 + $0x1], 1 }
  0xfc   :  { %225 = vsyncpa [#allocation4], 1 }
  0xfd   :  { %227 = vsyncpa [#allocation4 + $0x1], 1 }

</bundles_post_ra>
